<compile_context>
chip_gen: v7x
topology: tpu7x:2x2x1
jax: 0.10.0
libtpu: 0.0.40
codegen_flags: <defaults>
</compile_context>

<pallas_src>
import functools
import math

import numpy as np

import jax
import jax.numpy as jnp
from jax.experimental import pallas as pl
from jax.experimental.pallas import tpu as pltpu


def _pos_enc_kernel(tab_ref, noise_ref, out_ref, *, k):
    """tab_ref: (3, L) f32 [freq; phase; group], noise_ref: (TR, k), out_ref: (TR, L).

    Lane l of the output holds batch sub-row g = l // dim, position p = l % dim:
       out[r, l] = sin(noise[r, g] * freq[l] + phase[l])
    with phase = 0 on sin lanes (p < count) and pi/2 on cos lanes (p >= count).
    """
    TR = noise_ref.shape[0]
    L = out_ref.shape[1]  # k * dim

    freq = tab_ref[0:1, :]                                    # (1, L) f32
    phase = tab_ref[1:2, :]                                   # (1, L) f32

    noise = noise_ref[...].astype(jnp.float32)                # (TR, k)

    # Expand noise (TR, k) across lanes: lane l takes noise[:, l // dim].
    # Seed with a plain lane-broadcast of column 0, then k-1 selects keyed on
    # the precomputed per-lane group id (k is a small static constant).
    noise_lanes = jnp.broadcast_to(noise[:, 0:1], (TR, L))    # (TR, L)
    if k > 1:
        group = tab_ref[2:3, :]                               # (1, L) f32 group ids
        for i in range(1, k):
            noise_lanes = jnp.where(group == float(i), noise[:, i:i + 1], noise_lanes)

    # One transcendental per lane; single full-width store.
    enc = noise_lanes * freq + phase                          # (TR, L) f32
    out_ref[...] = jnp.sin(enc).astype(out_ref.dtype)


def positional_encoding(noise_level: jax.Array, dim: int, *, block_rows: int = 4096) -> jax.Array:
    """noise_level: (B,) -> (B, dim) positional encoding (sin half, cos half)."""
    assert dim % 2 == 0, "dim must be even"
    count = dim // 2
    B = noise_level.shape[0]
    out_dtype = noise_level.dtype   # pass bf16 noise to get a bf16 store (math stays f32)

    # Fold factor k: pack k batch rows per kernel row so the kernel's last dim
    # is a multiple of 128 lanes (unmasked full-vreg stores).
    if dim % 128 == 0:
        k = 1                                   # already lane-dense
    elif 128 % dim == 0 and (128 // dim) <= 32 and B % (128 // dim) == 0:
        k = 128 // dim                          # fold batch into lanes
    else:
        k = 1                                   # fallback: correct but <128-lane stores

    R = B // k                                  # kernel rows
    L = k * dim                                 # kernel lane width

    # Grid-invariant per-lane constants, precomputed once on the host:
    #   row 0: frequency  exp(-log(1e4) * ((l % dim) % count) / count)
    #   row 1: phase      0 for sin lanes, pi/2 for cos lanes
    #   row 2: group      l // dim  (which folded batch column feeds lane l)
    lane = np.arange(L, dtype=np.int64)
    within = lane % dim
    fidx = within % count
    freq = np.exp((-math.log(10000.0) / count) * fidx.astype(np.float64))
    phase = np.where(within < count, 0.0, math.pi / 2.0)
    group = (lane // dim).astype(np.float64)
    table = jnp.asarray(np.stack([freq, phase, group], axis=0), dtype=jnp.float32)  # (3, L)

    noise2d = noise_level.reshape(R, k)         # free reshape of (B,)

    # Batch tiling: single block for small R, otherwise a 1-D grid of row tiles.
    TR = R if R <= block_rows else block_rows
    grid = (pl.cdiv(R, TR),)

    kernel = functools.partial(_pos_enc_kernel, k=k)

    out_folded = pl.pallas_call(
        kernel,
        out_shape=jax.ShapeDtypeStruct((R, L), out_dtype),
        grid=grid,
        in_specs=[
            pl.BlockSpec((3, L), lambda r: (0, 0)),     # constant block: fetched once
            pl.BlockSpec((TR, k), lambda r: (r, 0)),
        ],
        out_specs=pl.BlockSpec((TR, L), lambda r: (r, 0)),
        compiler_params=pltpu.CompilerParams(
            dimension_semantics=("parallel",)),
    )(table, noise2d)

    # (R, k*dim) row-major is byte-identical to (B, dim) row-major.
    return out_folded.reshape(B, dim)


def _reference(noise_level: jax.Array, dim: int) -> jax.Array:
    count = dim // 2
    step = jnp.arange(count, dtype=jnp.float32) / count
    enc = noise_level.astype(jnp.float32)[:, None] * jnp.exp(-math.log(10000.0) * step[None, :])
    out = jnp.concatenate([jnp.sin(enc), jnp.cos(enc)], axis=-1)
    return out.astype(noise_level.dtype)


if __name__ == "__main__":
    DIM = 32  # module hyperparameter `dim`
    key = jax.random.PRNGKey(0)
    k1, k2 = jax.random.split(key)

    # Small case (matches the module's typical usage): B=8, dim=32.
    B = 8
    noise_level = jax.random.uniform(k1, (B,), dtype=jnp.float32)
    out = jax.block_until_ready(positional_encoding(noise_level, DIM))
    ref = _reference(noise_level, DIM)
    assert out.shape == (B, DIM), out.shape
    assert jnp.allclose(out, ref, atol=1e-5, rtol=1e-5), "mismatch vs reference (small)"

    # Larger batch: folded lane-dense layout + 2-step grid (constant table
    # block is fetched once and reused across steps).
    B2 = 4096
    noise_level2 = jax.random.uniform(k2, (B2,), dtype=jnp.float32)
    out2 = jax.block_until_ready(positional_encoding(noise_level2, DIM, block_rows=512))
    ref2 = _reference(noise_level2, DIM)
    assert out2.shape == (B2, DIM), out2.shape
    assert jnp.allclose(out2, ref2, atol=1e-5, rtol=1e-5), "mismatch vs reference (large)"

    # bf16 output path (v5e writeback suggestion): compute in f32, store bf16.
    noise_bf16 = noise_level.astype(jnp.bfloat16)
    out_bf16 = jax.block_until_ready(positional_encoding(noise_bf16, DIM))
    ref_bf16 = _reference(noise_bf16, DIM)
    assert out_bf16.dtype == jnp.bfloat16
    assert jnp.allclose(out_bf16.astype(jnp.float32), ref_bf16.astype(jnp.float32),
                        atol=2e-2, rtol=2e-2), "mismatch vs reference (bf16)"

    print("KERNEL_OK")
</pallas_src>

<mosaic_0001>
module attributes {stable_mosaic.version = 11 : i64} {
  func.func @_pos_enc_kernel(%arg0: i32, %arg1: memref<3x128xf32, #tpu.memory_space<vmem>>, %arg2: memref<2x4xf32, #tpu.memory_space<vmem>>, %arg3: memref<2x128xf32, #tpu.memory_space<vmem>>) attributes {dimension_semantics = [#tpu.dimension_semantics<parallel>], iteration_bounds = array<i64: 1>, scalar_prefetch = 0 : i64, scratch_operands = 0 : i64, tpu.core_type = #tpu.core_type<tc>, window_params = [{pipeline_mode = #tpu.pipeline_mode<synchronous>, transform_indices = @transform_0, window_bounds = array<i64: 3, 128>}, {transform_indices = @transform_1, window_bounds = array<i64: 2, 4>}, {transform_indices = @transform_2, window_bounds = array<i64: 2, 128>}]} {
    %c0 = arith.constant 0 : index
    %c0_0 = arith.constant 0 : index
    %0 = vector.load %arg1[%c0, %c0_0] : memref<3x128xf32, #tpu.memory_space<vmem>>, vector<1x128xf32>
    %c1 = arith.constant 1 : index
    %c0_1 = arith.constant 0 : index
    %1 = vector.load %arg1[%c1, %c0_1] : memref<3x128xf32, #tpu.memory_space<vmem>>, vector<1x128xf32>
    %c0_2 = arith.constant 0 : index
    %c0_3 = arith.constant 0 : index
    %2 = vector.load %arg2[%c0_2, %c0_3] : memref<2x4xf32, #tpu.memory_space<vmem>>, vector<2x4xf32>
    %3 = vector.extract_strided_slice %2 {offsets = [0, 0], sizes = [2, 1], strides = [1, 1]} : vector<2x4xf32> to vector<2x1xf32>
    %4 = vector.shape_cast %3 : vector<2x1xf32> to vector<2x1xf32>
    %5 = vector.broadcast %4 : vector<2x1xf32> to vector<2x128xf32>
    %c2 = arith.constant 2 : index
    %c0_4 = arith.constant 0 : index
    %6 = vector.load %arg1[%c2, %c0_4] : memref<3x128xf32, #tpu.memory_space<vmem>>, vector<1x128xf32>
    %cst = arith.constant 1.000000e+00 : f32
    %7 = vector.broadcast %cst : f32 to vector<1x128xf32>
    %8 = arith.cmpf oeq, %6, %7 : vector<1x128xf32>
    %9 = vector.extract_strided_slice %2 {offsets = [0, 1], sizes = [2, 1], strides = [1, 1]} : vector<2x4xf32> to vector<2x1xf32>
    %10 = vector.shape_cast %8 : vector<1x128xi1> to vector<1x128xi1>
    %11 = vector.broadcast %10 : vector<1x128xi1> to vector<2x128xi1>
    %12 = vector.shape_cast %9 : vector<2x1xf32> to vector<2x1xf32>
    %13 = vector.broadcast %12 : vector<2x1xf32> to vector<2x128xf32>
    %14 = arith.select %11, %13, %5 : vector<2x128xi1>, vector<2x128xf32>
    %cst_5 = arith.constant 2.000000e+00 : f32
    %15 = vector.broadcast %cst_5 : f32 to vector<1x128xf32>
    %16 = arith.cmpf oeq, %6, %15 : vector<1x128xf32>
    %17 = vector.extract_strided_slice %2 {offsets = [0, 2], sizes = [2, 1], strides = [1, 1]} : vector<2x4xf32> to vector<2x1xf32>
    %18 = vector.shape_cast %16 : vector<1x128xi1> to vector<1x128xi1>
    %19 = vector.broadcast %18 : vector<1x128xi1> to vector<2x128xi1>
    %20 = vector.shape_cast %17 : vector<2x1xf32> to vector<2x1xf32>
    %21 = vector.broadcast %20 : vector<2x1xf32> to vector<2x128xf32>
    %22 = arith.select %19, %21, %14 : vector<2x128xi1>, vector<2x128xf32>
    %cst_6 = arith.constant 3.000000e+00 : f32
    %23 = vector.broadcast %cst_6 : f32 to vector<1x128xf32>
    %24 = arith.cmpf oeq, %6, %23 : vector<1x128xf32>
    %25 = vector.extract_strided_slice %2 {offsets = [0, 3], sizes = [2, 1], strides = [1, 1]} : vector<2x4xf32> to vector<2x1xf32>
    %26 = vector.shape_cast %24 : vector<1x128xi1> to vector<1x128xi1>
    %27 = vector.broadcast %26 : vector<1x128xi1> to vector<2x128xi1>
    %28 = vector.shape_cast %25 : vector<2x1xf32> to vector<2x1xf32>
    %29 = vector.broadcast %28 : vector<2x1xf32> to vector<2x128xf32>
    %30 = arith.select %27, %29, %22 : vector<2x128xi1>, vector<2x128xf32>
    %31 = vector.broadcast %0 : vector<1x128xf32> to vector<2x128xf32>
    %32 = arith.mulf %30, %31 : vector<2x128xf32>
    %33 = vector.broadcast %1 : vector<1x128xf32> to vector<2x128xf32>
    %34 = arith.addf %32, %33 : vector<2x128xf32>
    %35 = math.sin %34 : vector<2x128xf32>
    %c0_7 = arith.constant 0 : index
    %c0_8 = arith.constant 0 : index
    %36 = vector.load %arg3[%c0_7, %c0_8] : memref<2x128xf32, #tpu.memory_space<vmem>>, vector<2x128xf32>
    tpu.vector_store %arg3[%c0_7, %c0_8], %35 {strides = array<i32>} : memref<2x128xf32, #tpu.memory_space<vmem>>, vector<2x128xf32>,
    return
  }
  func.func @transform_0(%arg0: i32) -> (i32, i32) {
    %c0_i32 = arith.constant 0 : i32
    %c0_i32_0 = arith.constant 0 : i32
    %c0_i32_1 = arith.constant 0 : i32
    return %c0_i32, %c0_i32_0 : i32, i32
  }
  func.func @transform_1(%arg0: i32) -> (i32, i32) {
    %c0_i32 = arith.constant 0 : i32
    %c0_i32_0 = arith.constant 0 : i32
    return %arg0, %c0_i32 : i32, i32
  }
  func.func @transform_2(%arg0: i32) -> (i32, i32) {
    %c0_i32 = arith.constant 0 : i32
    %c0_i32_0 = arith.constant 0 : i32
    return %arg0, %c0_i32 : i32, i32
  }
}

</mosaic_0001>

<bundles_post_ra>
// kernel: tpu_custom_call.1
= control target key start
LH: loop header
LB: loop body
LE: loop exit
PB: predicated region body
PF: predicated region fallthrough
CT: control target
= control target key end

     0   :  { %7 = vsyncpa [#allocation3], 0  ;;  %s353_s0 = inlined_call_operand.hbm [shape: f32[3,128], index: 0, kind: input, shape index: {}]   ;;  %s354_s1 = inlined_call_operand.vmem [shape: f32[2,4], index: 1, kind: input, shape index: {}]   ;;  %s355_s2 = inlined_call_operand.hbm [shape: f32[2,128], index: 2, kind: output, shape index: {}]  }
   0x1   :  { %8 = vsyncpa [#allocation4], 0  ;;  %s278_s9 = smov [#allocation2]   ;;  %s230_s13 = scalar_lea.hbm %s353_s0, 64 }
   0x2   :  { %s15_s10 = sshll.u32 %s278_s9, 4  ;;  %p231_p0 = scmp.ne.s32.totalorder %s353_s0, %s230_s13  ;;  %s16_s10 = int_to_ptr.vmem [resolvable:$true] %s15_s10 }
   0x3   :  { %p234_p1 = scmp.lt.u32.totalorder %s230_s13, %s353_s0 }
   0x5   :  { %p236_p2 = pnand %p234_p1, %p231_p0 }
   0x7   :  { %239 = shalt.err (!%p236_p2)
}
   0x8   :  { %s240_s18 = scalar_lea.vmem %s16_s10, 64  ;;  %p245_p4 = scmp.lt.s32.totalorder %s16_s10, %s16_s10 }
   0x9   :  { %p241_p3 = scmp.ne.s32.totalorder %s16_s10, %s240_s18  ;;  %p246_p5 = scmp.lt.s32.totalorder %s240_s18, %s240_s18 }
   0xb   :  { %p247_p6 = por %p246_p5, %p245_p4 }
   0xd   :  { %p248_p7 = pnand %p247_p6, %p241_p3 }
   0xf   :  { %251 = shalt.err (!%p248_p7)
}
  0x10   :  { %18 = dma.hbm_to_vmem [thread:$0]  %s353_s0, 64, %s16_s10, [#allocation3]  }
  0x11   :  { %274 = dma.done.wait [#allocation3], 64  }
  0x12   :  { %275 = vsyncadd [#allocation3], 4294967232  ;;  %v279_v0 = vmov 0   ;;  %v280_v1 = vmov 2   ;;  %v26_v2 = vld [vmem:[%s354_s1] sm:$0x3]  ;;  %v35_v5 = vlaneseq }
  0x13   :  { %221 = vset.pattern.permute.xlu0 %v279_v0  ;;  %223 = vset.pattern.permute.xlu1 %v280_v1  ;;  %v281_v3 = vmov 1   ;;  %v282_v4 = vmov 3   ;;  %v32_v6 = vld [vmem:[#allocation2 + $0x2] sm:$0x1]  ;;  %v199_v20 = vld [vmem:[#allocation2] ss:$0 sm:$0xff] }
  0x14   :  { %29 = vperm.xlu0 %221, %v26_v2   ;;  %53 = vperm.xlu1 %223, %v26_v2   ;;  %v36_v7 = vshrl.u32 %v35_v5, 7  ;;  %vm33_vm0 = vcmp.eq.f32.partialorder %v32_v6, 1.0  ;;  %vm45_vm1 = vcmp.eq.f32.partialorder %v32_v6, 2.0  ;;  %vm57_vm2 = vcmp.eq.f32.partialorder %v32_v6, 3.0  ;;  %v200_v22 = vld [vmem:[#allocation2 + $0x1] ss:$0 sm:$0xff] }
  0x15   :  { %v34_v9 = vsel %vm33_vm0, 1, %v279_v0  ;;  %v46_v10 = vsel %vm45_vm1, 1, %v279_v0  ;;  %v58_v11 = vsel %vm57_vm2, 1, %v279_v0  ;;  %v283_v36 = vmov 683565275   ;;  %s289_s0 = smov [#allocation5]  }
  0x16   :  { %v37_v8 = vsub.s32 0, %v36_v7  ;;  %v284_v38 = vmov 2475754826   ;;  %v285_v41 = vmov 2131351028   ;;  %s190_s1 = sshll.u32 %s289_s0, 4  ;;  %s191_s1 = int_to_ptr.vmem [resolvable:$true] %s190_s1 }
  0x17   :  { %v286_v44 = vmov 2102212464   ;;  %v287_v47 = vmov 920167782   ;;  %v288_v50 = vmov 1326507024   ;;  %p257_p9 = scmp.lt.s32.totalorder %s191_s1, %s191_s1 }
  0x18   :  { %222 = vset.pattern.permute.xlu0 %v281_v3  ;;  %224 = vset.pattern.permute.xlu1 %v282_v4  ;;  %v38_v12 = vrot.slane %v34_v9, %v37_v8  ;;  %v50_v15 = vrot.slane %v46_v10, %v37_v8  ;;  %v62_v16 = vrot.slane %v58_v11, %v37_v8  ;;  %s252_s23 = scalar_lea.vmem %s191_s1, 32 }
  0x19   :  { %41 = vperm.xlu0 %222, %v26_v2   ;;  %65 = vperm.xlu1 %224, %v26_v2   ;;  %p253_p8 = scmp.ne.s32.totalorder %s191_s1, %s252_s23  ;;  %p258_p10 = scmp.lt.s32.totalorder %s252_s23, %s252_s23 }
  0x1a   :  { %vm39_vm3 = vcmp.eq.s32.totalorder %v38_v12, 1  ;;  %vm51_vm4 = vcmp.eq.s32.totalorder %v50_v15, 1  ;;  %vm63_vm5 = vcmp.eq.s32.totalorder %v62_v16, 1 }
  0x1b   :  { %p259_p11 = por %p258_p10, %p257_p9 }
  0x1d   :  { %225 = vset.pattern.permute.xlu0 %v282_v4  ;;  %p260_p12 = pnand %p259_p11, %p253_p8 }
  0x93   :  { %v30_v13 = vpop.permute.xlu0 %29  ;;  %v54_v14 = vpop.permute.xlu1 %53 }
  0x98   :  { %v42_v17 = vpop.permute.xlu0 %41  ;;  %v66_v18 = vpop.permute.xlu1 %65 }
  0x99   :  { %v44_v19 = vsel %vm39_vm3, %v42_v17, %v30_v13 }
  0x9a   :  { %v56_v21 = vsel %vm51_vm4, %v54_v14, %v44_v19 }
  0x9b   :  { %v68_v23 = vsel %vm63_vm5, %v66_v18, %v56_v21 }
  0x9c   :  { %v73_v24 = vmul.f32 %v199_v20, %v68_v23 }
  0x9e   :  { %v320_v25 = vadd.f32 %v200_v22, %v73_v24 }
  0xa0   :  { %v82_v26 = vand.u32 2139095040, %v320_v25  ;;  %v79_v30 = vand.u32 2147483647, %v320_v25  ;;  %vm81_vm13 = vcmp.lt.s32.totalorder %v320_v25, 0  ;;  %vm171_vm2 = vweird.f32 %v320_v25 }
  0xa2   :  { %v83_v27 = vshrl.u32 %v82_v26, 23  ;;  %v86_v34 = vand.u32 8388607, %v79_v30  ;;  %vm80_vm14 = vcmp.le.f32.partialorder %v79_v30, 0.7853982 }
  0xa4   :  { %v201_v28 = vadd.s32 4294967169, %v83_v27  ;;  %v87_v52 = vor.u32 8388608, %v86_v34 }
  0xa6   :  { %v89_v29 = vadd.s32 1, %v201_v28  ;;  %v127_v2 = vshll.u32 %v87_v52, 8 }
  0xa8   :  { %vm90_vm6 = vcmp.gt.s32.totalorder %v89_v29, 0 }
  0xa9   :  { %v91_v31 = vsel %vm90_vm6, %v89_v29, 0 }
  0xaa   :  { %v93_v32 = vand.u32 31, %v91_v31  ;;  %v92_v35 = vshrl.u32 %v91_v31, 5 }
  0xac   :  { %v94_v33 = vsub.s32 32, %v93_v32  ;;  %v96_v37 = vshll.u32 %v283_v36, %v93_v32  ;;  %v99_v39 = vshll.u32 %v284_v38, %v93_v32  ;;  %v102_v43 = vshll.u32 %v285_v41, %v93_v32 }
  0xad   :  { %v105_v46 = vshll.u32 %v286_v44, %v93_v32  ;;  %v108_v49 = vshll.u32 %v287_v47, %v93_v32  ;;  %vm111_vm7 = vcmp.lt.s32.totalorder %v92_v35, 1  ;;  %vm114_vm8 = vcmp.lt.s32.totalorder %v92_v35, 4 }
  0xae   :  { %v97_v40 = vshrl.u32 %v284_v38, %v94_v33  ;;  %v100_v42 = vshrl.u32 %v285_v41, %v94_v33  ;;  %v103_v45 = vshrl.u32 %v286_v44, %v94_v33  ;;  %v106_v48 = vshrl.u32 %v287_v47, %v94_v33 }
  0xaf   :  { %v109_v51 = vshrl.u32 %v288_v50, %v94_v33  ;;  %v95_v61 = vshrl.u32 %v283_v36, %v94_v33  ;;  %vm113_vm9 = vcmp.lt.s32.totalorder %v92_v35, 3  ;;  %vm112_vm10 = vcmp.lt.s32.totalorder %v92_v35, 2 }
  0xb0   :  { %v98_v53 = vor.u32 %v97_v40, %v96_v37  ;;  %v101_v54 = vor.u32 %v100_v42, %v99_v39  ;;  %v104_v55 = vor.u32 %v103_v45, %v102_v43  ;;  %v107_v56 = vor.u32 %v106_v48, %v105_v46 }
  0xb1   :  { %v110_v57 = vor.u32 %v109_v51, %v108_v49 }
  0xb2   :  { %v116_v58 = vsel %vm114_vm8, %v104_v55, 2102212464  ;;  %v119_v59 = vsel %vm111_vm7, %v98_v53, %v101_v54  ;;  %v123_v60 = vsel %vm111_vm7, %v101_v54, %v104_v55  ;;  %v120_v62 = vsel %vm114_vm8, %v107_v56, 920167782 }
  0xb3   :  { %v124_v63 = vsel %vm114_vm8, %v110_v57, 1326507024  ;;  %v121_v0 = vsel %vm113_vm9, %v104_v55, %v120_v62  ;;  %v115_v3 = vsel %vm111_vm7, %v95_v61, %v98_v53  ;;  %v117_v4 = vsel %vm113_vm9, %v101_v54, %v116_v58 }
  0xb4   :  { %v125_v1 = vsel %vm113_vm9, %v107_v56, %v124_v63  ;;  %v122_v5 = vsel %vm112_vm10, %v119_v59, %v121_v0  ;;  %v118_v11 = vsel %vm112_vm10, %v115_v3, %v117_v4 }
  0xb5   :  { %v126_v6 = vsel %vm112_vm10, %v123_v60, %v125_v1  ;;  %v329_v9 = vmul.u32.u64.low %v127_v2, %v122_v5  ;;  %v330_v10 = vmul.u32.u64.high %v127_v2, %v122_v5, %v329_v9  ;;  %v134_v13 = vmul.u32 %v127_v2, %v118_v11 }
  0xb6   :  { %v326_v7 = vmul.u32.u64.low %v127_v2, %v126_v6  ;;  %v327_v8 = vmul.u32.u64.high %v127_v2, %v126_v6, %v326_v7 }
  0xb7   :  { %v137_v12 = vadd.s32 1, %v330_v10 }
  0xb8   :  { %vm136_vm11 = vc.u32 %v327_v8, %v329_v9  ;;  %v135_v26 = vadd.s32 %v329_v9, %v327_v8 }
  0xb9   :  { %v138_v14 = vsel %vm136_vm11, %v137_v12, %v330_v10 }
  0xba   :  { %v139_v15 = vadd.s32 %v138_v14, %v134_v13 }
  0xbc   :  { %v140_v16 = vadd.s32 536870912, %v139_v15 }
  0xbe   :  { %v141_v17 = vshrl.u32 %v140_v16, 30 }
  0xc0   :  { %v142_v18 = vshll.u32 %v141_v17, 30  ;;  %v165_v39 = vsub.s32 4, %v141_v17 }
  0xc2   :  { %v143_v19 = vsub.s32 %v139_v15, %v142_v18  ;;  %v166_v42 = vsel %vm81_vm13, %v165_v39, %v141_v17 }
  0xc3   :  { %v168_v44 = vsel %vm80_vm14, 0, %v166_v42 }
  0xc4   :  { %v145_v20 = vsub.s32 0, %v143_v19  ;;  %v172_v45 = vadd.s32 3, %v168_v44 }
  0xc6   :  { %v202_v21 = vmin.u32 %v145_v20, %v143_v19  ;;  %v173_v46 = vand.u32 3, %v172_v45 }
  0xc8   :  { %v147_v22 = vclz %v202_v21  ;;  %vm178_vm15 = vcmp.eq.s32.totalorder %v173_v46, 2  ;;  %vm175_vm0 = vcmp.eq.s32.totalorder %v173_v46, 0  ;;  %vm174_vm1 = vcmp.lt.s32.totalorder %v173_v46, 2 }
  0xca   :  { %v203_v23 = vadd.s32 4294967294, %v147_v22 }
  0xcc   :  { %vm204_vm12 = vcmp.lt.s32.totalorder %v203_v23, 0 }
  0xcd   :  { %v150_v24 = vsel %vm204_vm12, 0, %v203_v23 }
  0xce   :  { %v151_v27 = vsub.s32 32, %v150_v24  ;;  %v155_v28 = vsub.s32 4294967266, %v150_v24  ;;  %v152_v29 = vshll.u32 %v143_v19, %v150_v24 }
  0xd0   :  { %v153_v31 = vshrl.u32 %v135_v26, %v151_v27  ;;  %v156_v32 = vadd.s32 127, %v155_v28 }
  0xd2   :  { %v154_v33 = vor.u32 %v153_v31, %v152_v29  ;;  %v157_v34 = vshll.u32 %v156_v32, 23 }
  0xd4   :  { %v158_v35 = vor.u32 4788187, %v157_v34  ;;  %v161_v37 = vcvt.s32.f32 %v154_v33 }
  0xd6   :  { %v159_v36 = vand.u32 2147483647, %v158_v35 }
  0xd8   :  { %v162_v38 = vmul.f32 %v161_v37, %v159_v36 }
  0xda   :  { %v163_v40 = vxor.u32 2147483648, %v162_v38 }
  0xdc   :  { %v164_v41 = vsel %vm81_vm13, %v163_v40, %v162_v38 }
  0xdd   :  { %v167_v43 = vsel %vm80_vm14, %v320_v25, %v164_v41 }
  0xde   :  { %226 = vcosq.f32 %v167_v43 }
  0xdf   :  { %228 = vsinq.f32 %v167_v43 }
  0xe8   :  { %v227_v47 = vpop.eup %226 }
  0xe9   :  { %v229_v48 = vpop.eup %228  ;;  %v179_v49 = vxor.u32 2147483648, %v227_v47 }
  0xea   :  { %v176_v50 = vxor.u32 2147483648, %v229_v48 }
  0xeb   :  { %v180_v51 = vsel %vm178_vm15, %v179_v49, %v229_v48 }
  0xec   :  { %v177_v30 = vsel %vm175_vm0, %v227_v47, %v176_v50 }
  0xed   :  { %v181_v52 = vsel %vm174_vm1, %v177_v30, %v180_v51 }
  0xee   :  { %v182_v53 = vsel %vm171_vm2, nan, %v181_v52 }
  0xef   :  { %183 = vst [vmem:[#allocation5] sm:$0x3] %v182_v53 }
  0xf0   :  { %263 = shalt.err (!%p260_p12)
}
  0xf1   :  { %s264_s26 = scalar_lea.hbm %s355_s2, 32 }
  0xf2   :  { %p265_p13 = scmp.ne.s32.totalorder %s355_s2, %s264_s26  ;;  %p268_p0 = scmp.lt.u32.totalorder %s264_s26, %s355_s2 }
  0xf4   :  { %p270_p1 = pnand %p268_p0, %p265_p13 }
  0xf6   :  { %273 = shalt.err (!%p270_p1)
}
  0xf7   :  { %193 = dma.vmem_to_hbm [thread:$0]  %s191_s1, 32, %s355_s2, [#allocation4]  }
  0xf8   :  { %276 = dma.done.wait [#allocation4], 32  }
  0xf9   :  { %277 = vsyncadd [#allocation4], 4294967264 }
  0xfa   :  { %197 = vsyncpa [#allocation3], 1 }
  0xfb   :  { %198 = vsyncpa [#allocation4], 1 }

</bundles_post_ra>
